<compile_context>
chip_gen: v7x
topology: tpu7x:2x2x1
jax: 0.10.0
libtpu: 0.0.40
codegen_flags: <defaults>
</compile_context>

<pallas_src>
import jax
import jax.numpy as jnp
from jax import lax
from jax.experimental import pallas as pl
from jax.experimental.pallas import tpu as pltpu


def _round_up(x: int, m: int) -> int:
    return ((x + m - 1) // m) * m


def clip_weights(w, weight_min=None, weight_max=None):
    """Functional stand-in for WeightClipper's in-place clamp (tiny op)."""
    lo = -jnp.inf if weight_min is None else weight_min
    hi = jnp.inf if weight_max is None else weight_max
    return jnp.clip(w, lo, hi)


def _modelfc_kernel(bounds_ref, x_ref, w_ref, y_ref):
    """One batch tile: y = x @ clamp(W, wmin, wmax).T, fused on-chip.

    bounds_ref : SMEM (2,) f32        -> [weight_min, weight_max]
    x_ref      : VMEM (TB, K_pad)     -> batch tile of observations
    w_ref      : VMEM (N_pad, K_pad)  -> full weight, resident across the grid
    y_ref      : VMEM (TB, N_pad)     -> lane-dense output tile
    """
    wmin = bounds_ref[0]
    wmax = bounds_ref[1]

    # Fused clamp: VPU work hidden under the MXU push; W was DMA'd once.
    w_clamped = jnp.clip(w_ref[...], wmin, wmax)

    # Contract last (lane) dim of both operands: (TB,K) . (N,K) -> (TB,N).
    # No transpose of W is ever materialized.
    y_ref[...] = lax.dot_general(
        x_ref[...],
        w_clamped,
        dimension_numbers=(((1,), (1,)), ((), ())),
        preferred_element_type=jnp.float32,
    ).astype(y_ref.dtype)


def model_fc_forward(x, w, weight_min=None, weight_max=None, *, batch_tile=512):
    """ModelFc.forward: clamp(W, min, max) then x @ W.T.

    x : (batch, dim_observation)
    w : (dim_action, dim_observation)   -- nn.Linear weight layout
    returns (batch, dim_action) float32
    """
    x = jnp.asarray(x, jnp.float32)
    w = jnp.asarray(w, jnp.float32)
    B, K = x.shape
    N, K_w = w.shape
    assert K == K_w, f"dim_observation mismatch: x has {K}, w has {K_w}"

    lo = jnp.float32(-jnp.inf if weight_min is None else weight_min)
    hi = jnp.float32(jnp.inf if weight_max is None else weight_max)
    bounds = jnp.stack([lo, hi])  # (2,) f32, lands in SMEM

    # Respect the (8,128) constraint and keep the output lane-dense.
    K_pad = _round_up(max(K, 1), 128)
    N_pad = _round_up(max(N, 1), 128)
    TB = min(batch_tile, _round_up(max(B, 1), 8))
    TB = _round_up(TB, 8)
    B_pad = _round_up(max(B, 1), TB)

    x_p = jnp.zeros((B_pad, K_pad), jnp.float32).at[:B, :K].set(x)
    w_p = jnp.zeros((N_pad, K_pad), jnp.float32).at[:N, :K].set(w)

    grid = (B_pad // TB,)

    y_p = pl.pallas_call(
        _modelfc_kernel,
        out_shape=jax.ShapeDtypeStruct((B_pad, N_pad), jnp.float32),
        grid_spec=pltpu.PrefetchScalarGridSpec(
            num_scalar_prefetch=0,
            grid=grid,
            in_specs=[
                # clamp bounds: whole (2,) array in SMEM, untiled
                pl.BlockSpec(memory_space=pltpu.MemorySpace.SMEM),
                # x: one batch tile per grid step
                pl.BlockSpec((TB, K_pad), lambda i: (i, 0)),
                # W: constant block index -> DMA'd once, resident in VMEM
                pl.BlockSpec((N_pad, K_pad), lambda i: (0, 0)),
            ],
            out_specs=pl.BlockSpec((TB, N_pad), lambda i: (i, 0)),
        ),
        compiler_params=pltpu.CompilerParams(
            # batch axis is independent -> shard across TensorCores on v7x
            dimension_semantics=("parallel",),
            # small buffers (few hundred KB double-buffered): safe on
            # v5e/v6e (128 MiB VMEM) and v7x (64 MiB VMEM).
            vmem_limit_bytes=32 * 1024 * 1024,
        ),
    )(bounds, x_p, w_p)

    return y_p[:B, :N]


if __name__ == "__main__":
    key = jax.random.PRNGKey(0)
    kx, kw = jax.random.split(key)

    # Small shapes consistent with ModelFc: a handful of observations/actions.
    batch = 16
    dim_observation = 5
    dim_action = 3
    weight_min, weight_max = -0.5, 0.5

    x = jax.random.normal(kx, (batch, dim_observation), dtype=jnp.float32)
    w = jax.random.normal(kw, (dim_action, dim_observation), dtype=jnp.float32)

    y = model_fc_forward(x, w, weight_min, weight_max)
    y = jax.block_until_ready(y)

    # Reference (float32 stand-in for the torch double): clamp(W) then x @ W.T
    w_clamped = clip_weights(w, weight_min, weight_max)
    y_ref = x @ w_clamped.T

    assert y.shape == (batch, dim_action), y.shape
    if not jnp.allclose(y, y_ref, atol=1e-5, rtol=1e-5):
        raise AssertionError(
            f"Pallas output mismatch: max abs err = {jnp.max(jnp.abs(y - y_ref))}"
        )

    print("KERNEL_OK")
</pallas_src>

<mosaic_0001>
module attributes {stable_mosaic.version = 11 : i64} {
  func.func @_modelfc_kernel(%arg0: i32, %arg1: memref<2xf32, #tpu.memory_space<smem>>, %arg2: memref<16x128xf32, #tpu.memory_space<vmem>>, %arg3: memref<128x128xf32, #tpu.memory_space<vmem>>, %arg4: memref<16x128xf32, #tpu.memory_space<vmem>>) attributes {dimension_semantics = [#tpu.dimension_semantics<parallel>], iteration_bounds = array<i64: 1>, scalar_prefetch = 0 : i64, scratch_operands = 0 : i64, tpu.core_type = #tpu.core_type<tc>, window_params = [{transform_indices = @transform_0, window_bounds = array<i64: 2>}, {transform_indices = @transform_1, window_bounds = array<i64: 16, 128>}, {pipeline_mode = #tpu.pipeline_mode<synchronous>, transform_indices = @transform_2, window_bounds = array<i64: 128, 128>}, {transform_indices = @transform_3, window_bounds = array<i64: 16, 128>}]} {
    %c0 = arith.constant 0 : index
    %0 = memref.load %arg1[%c0] : memref<2xf32, #tpu.memory_space<smem>>
    %c1 = arith.constant 1 : index
    %1 = memref.load %arg1[%c1] : memref<2xf32, #tpu.memory_space<smem>>
    %c0_0 = arith.constant 0 : index
    %c0_1 = arith.constant 0 : index
    %2 = vector.load %arg3[%c0_0, %c0_1] : memref<128x128xf32, #tpu.memory_space<vmem>>, vector<128x128xf32>
    %3 = vector.broadcast %0 : f32 to vector<128x128xf32>
    %4 = arith.maximumf %3, %2 : vector<128x128xf32>
    %5 = vector.broadcast %1 : f32 to vector<128x128xf32>
    %6 = arith.minimumf %5, %4 : vector<128x128xf32>
    %c0_2 = arith.constant 0 : index
    %c0_3 = arith.constant 0 : index
    %7 = vector.load %arg2[%c0_2, %c0_3] : memref<16x128xf32, #tpu.memory_space<vmem>>, vector<16x128xf32>
    %cst = arith.constant dense<0.000000e+00> : vector<16x128xf32>
    %8 = tpu.matmul %7, %6, %cst {dimension_numbers = #tpu.dot_dimension_numbers<[1], [1], [0], [0], [0, 0, 1, 0], [], []>} : vector<16x128xf32>, vector<128x128xf32>, vector<16x128xf32> -> vector<16x128xf32>
    %c0_4 = arith.constant 0 : index
    %c0_5 = arith.constant 0 : index
    %9 = vector.load %arg4[%c0_4, %c0_5] : memref<16x128xf32, #tpu.memory_space<vmem>>, vector<16x128xf32>
    tpu.vector_store %arg4[%c0_4, %c0_5], %8 {strides = array<i32>} : memref<16x128xf32, #tpu.memory_space<vmem>>, vector<16x128xf32>,
    return
  }
  func.func @transform_0(%arg0: i32) -> i32 {
    %c0_i32 = arith.constant 0 : i32
    %c0_i32_0 = arith.constant 0 : i32
    return %c0_i32 : i32
  }
  func.func @transform_1(%arg0: i32) -> (i32, i32) {
    %c0_i32 = arith.constant 0 : i32
    %c0_i32_0 = arith.constant 0 : i32
    return %arg0, %c0_i32 : i32, i32
  }
  func.func @transform_2(%arg0: i32) -> (i32, i32) {
    %c0_i32 = arith.constant 0 : i32
    %c0_i32_0 = arith.constant 0 : i32
    %c0_i32_1 = arith.constant 0 : i32
    return %c0_i32, %c0_i32_0 : i32, i32
  }
  func.func @transform_3(%arg0: i32) -> (i32, i32) {
    %c0_i32 = arith.constant 0 : i32
    %c0_i32_0 = arith.constant 0 : i32
    return %arg0, %c0_i32 : i32, i32
  }
}

</mosaic_0001>

<bundles_post_ra>
// kernel: tpu_custom_call.1
= control target key start
LH: loop header
LB: loop body
LE: loop exit
PB: predicated region body
PF: predicated region fallthrough
CT: control target
= control target key end

     0   :  { %8 = vsyncpa [#allocation5], 0  ;;  %s499_s0 = inlined_call_operand.hbm [shape: f32[2], index: 0, kind: input, shape index: {}]   ;;  %s500_s1 = inlined_call_operand.hbm [shape: f32[16,128], index: 1, kind: input, shape index: {}]   ;;  %s501_s2 = inlined_call_operand.hbm [shape: f32[128,128], index: 2, kind: input, shape index: {}]   ;;  %s502_s3 = inlined_call_operand.hbm [shape: f32[16,128], index: 3, kind: output, shape index: {}]  }
   0x1   :  { %9 = vsyncpa [#allocation3], 0 }
   0x2   :  { %10 = vsyncpa [#allocation8], 0 }
   0x3   :  { %11 = vsyncpa [#allocation4], 0  ;;  %s296_s14 = scalar_lea.hbm %s499_s0, 16 }
   0x4   :  { %p297_p0 = scmp.ne.s32.totalorder %s499_s0, %s296_s14  ;;  %p300_p1 = scmp.lt.u32.totalorder %s296_s14, %s499_s0 }
   0x6   :  { %p302_p2 = pnand %p300_p1, %p297_p0 }
   0x8   :  { %305 = shalt.err (!%p302_p2)
}
   0x9   :  { %s380_s19 = smov [#allocation2]   ;;  %s381_s22 = smov [#allocation6]  }
   0xa   :  { %19 = dma.hbm_to_smem %s499_s0, 16, %s380_s19, [#allocation5]  }
   0xb   :  { %s25_s23 = sshll.u32 %s381_s22, 4  ;;  %s306_s26 = scalar_lea.hbm %s500_s1, 256  ;;  %s26_s23 = int_to_ptr.vmem [resolvable:$true] %s25_s23 }
   0xc   :  { %p307_p3 = scmp.ne.s32.totalorder %s500_s1, %s306_s26  ;;  %p310_p4 = scmp.lt.u32.totalorder %s306_s26, %s500_s1 }
   0xe   :  { %p312_p5 = pnand %p310_p4, %p307_p3 }
  0x10   :  { %315 = shalt.err (!%p312_p5)
}
  0x11   :  { %s316_s4 = scalar_lea.vmem %s26_s23, 256  ;;  %p321_p7 = scmp.lt.s32.totalorder %s26_s23, %s26_s23 }
  0x12   :  { %p317_p6 = scmp.ne.s32.totalorder %s26_s23, %s316_s4  ;;  %p322_p8 = scmp.lt.s32.totalorder %s316_s4, %s316_s4 }
  0x14   :  { %p323_p9 = por %p322_p8, %p321_p7 }
  0x16   :  { %p324_p10 = pnand %p323_p9, %p317_p6 }
  0x18   :  { %327 = shalt.err (!%p324_p10)
}
  0x19   :  { %s382_s0 = smov 128   ;;  %s383_s5 = smov 8  }
  0x1a   :  { %31 = dma.hbm_to_vmem [thread:$0]  %s500_s1, 256, %s26_s23, [#allocation3], %s382_s0, %s382_s0, %s383_s5  }
  0x1b   :  { %s384_s8 = smov [#allocation7]   ;;  %s328_s12 = scalar_lea.hbm %s501_s2, 2048 }
  0x1c   :  { %s37_s9 = sshll.u32 %s384_s8, 4  ;;  %p329_p11 = scmp.ne.s32.totalorder %s501_s2, %s328_s12  ;;  %s38_s9 = int_to_ptr.vmem [resolvable:$true] %s37_s9 }
  0x1d   :  { %p332_p12 = scmp.lt.u32.totalorder %s328_s12, %s501_s2 }
  0x1f   :  { %p334_p13 = pnand %p332_p12, %p329_p11 }
  0x21   :  { %337 = shalt.err (!%p334_p13)
}
  0x22   :  { %s338_s17 = scalar_lea.vmem %s38_s9, 2048  ;;  %p343_p1 = scmp.lt.s32.totalorder %s38_s9, %s38_s9 }
  0x23   :  { %p339_p0 = scmp.ne.s32.totalorder %s38_s9, %s338_s17  ;;  %p344_p2 = scmp.lt.s32.totalorder %s338_s17, %s338_s17 }
  0x25   :  { %p345_p3 = por %p344_p2, %p343_p1 }
  0x27   :  { %p346_p4 = pnand %p345_p3, %p339_p0 }
  0x29   :  { %349 = shalt.err (!%p346_p4)
}
  0x2a   :  { %43 = dma.hbm_to_vmem [thread:$0]  %s501_s2, 2048, %s38_s9, [#allocation8], %s382_s0, %s382_s0, %s383_s5  }
  0x2b   :  { %372 = dma.done.wait [#allocation5], 16  }
  0x2c   :  { %373 = vsyncadd [#allocation5], 4294967280 }
  0x2d   :  { %374 = dma.done.wait [#allocation3], 256  }
  0x2e   :  { %375 = vsyncadd [#allocation3], 4294967040 }
  0x2f   :  { %376 = dma.done.wait [#allocation8], 2048  }
  0x30   :  { %377 = vsyncadd [#allocation8], 4294965248 }
  0x31   :  { %53 = sfence }
  0x32   :  { %s54_s19 = sld [smem:[#allocation2]]  ;;  %s204_s20 = sld [smem:[#allocation2 + $0x1]]  ;;  %v56_v0 = vld [vmem:[#allocation7] sm:$0xff]  ;;  %v57_v1 = vld [vmem:[#allocation7 + $0x8] sm:$0xff]  ;;  %v58_v2 = vld [vmem:[#allocation7 + $0x10] sm:$0xff] }
  0x33   :  { %v59_v3 = vld [vmem:[#allocation7 + $0x18] sm:$0xff]  ;;  %v106_v4 = vld [vmem:[#allocation6] sm:$0xff]  ;;  %v60_v11 = vld [vmem:[#allocation7 + $0x20] sm:$0xff]  ;;  %s385_s2 = smov [#allocation9]  }
  0x34   :  { %255 = vmatprep.mubr.f32.mxu0 %v106_v4  ;;  %v61_v12 = vld [vmem:[#allocation7 + $0x28] sm:$0xff]  ;;  %v62_v23 = vld [vmem:[#allocation7 + $0x30] sm:$0xff]  ;;  %v63_v24 = vld [vmem:[#allocation7 + $0x38] sm:$0xff]  ;;  %s190_s21 = sshll.u32 %s385_s2, 4  ;;  %s191_s21 = int_to_ptr.vmem [resolvable:$true] %s190_s21 }
  0x35   :  { %v64_v30 = vld [vmem:[#allocation7 + $0x40] sm:$0xff]  ;;  %v65_v31 = vld [vmem:[#allocation7 + $0x48] sm:$0xff]  ;;  %v66_v37 = vld [vmem:[#allocation7 + $0x50] sm:$0xff]  ;;  %s350_s22 = scalar_lea.vmem %s191_s21, 256  ;;  %p355_p6 = scmp.lt.s32.totalorder %s191_s21, %s191_s21 }
  0x36   :  { %v67_v38 = vld [vmem:[#allocation7 + $0x58] sm:$0xff]  ;;  %v68_v44 = vld [vmem:[#allocation7 + $0x60] sm:$0xff]  ;;  %v69_v45 = vld [vmem:[#allocation7 + $0x68] sm:$0xff]  ;;  %p351_p5 = scmp.ne.s32.totalorder %s191_s21, %s350_s22  ;;  %p356_p7 = scmp.lt.s32.totalorder %s350_s22, %s350_s22 }
  0x37   :  { %v70_v51 = vld [vmem:[#allocation7 + $0x70] sm:$0xff]  ;;  %v71_v52 = vld [vmem:[#allocation7 + $0x78] sm:$0xff] }
  0x38   :  { %v448_v5 = vstv %s54_s19  ;;  %v450_v6 = vstv %s204_s20  ;;  %v107_v59 = vld [vmem:[#allocation6 + $0x8] sm:$0xff]  ;;  %p357_p8 = por %p356_p7, %p355_p6 }
  0x39   :  { %v73_v7 = vmax.f32 %v448_v5, %v56_v0  ;;  %v74_v8 = vmax.f32 %v448_v5, %v57_v1  ;;  %v75_v9 = vmax.f32 %v448_v5, %v58_v2  ;;  %v76_v10 = vmax.f32 %v448_v5, %v59_v3 }
  0x3a   :  { %v77_v19 = vmax.f32 %v448_v5, %v60_v11  ;;  %v78_v20 = vmax.f32 %v448_v5, %v61_v12  ;;  %v79_v26 = vmax.f32 %v448_v5, %v62_v23  ;;  %v80_v27 = vmax.f32 %v448_v5, %v63_v24  ;;  %p358_p9 = pnand %p357_p8, %p351_p5 }
  0x3b   :  { %v90_v13 = vmin.f32 %v450_v6, %v73_v7  ;;  %v91_v14 = vmin.f32 %v450_v6, %v74_v8  ;;  %v92_v15 = vmin.f32 %v450_v6, %v75_v9  ;;  %v93_v16 = vmin.f32 %v450_v6, %v76_v10 }
  0x3c   :  { %v94_v21 = vmin.f32 %v450_v6, %v77_v19  ;;  %v95_v22 = vmin.f32 %v450_v6, %v78_v20  ;;  %v96_v28 = vmin.f32 %v450_v6, %v79_v26  ;;  %v97_v29 = vmin.f32 %v450_v6, %v80_v27 }
  0x3d   :  { %v258_v17 = vpack.c.bf16 %v91_v14, %v90_v13  ;;  %v262_v18 = vpack.c.bf16 %v93_v16, %v92_v15  ;;  %v81_v33 = vmax.f32 %v448_v5, %v64_v30  ;;  %v82_v34 = vmax.f32 %v448_v5, %v65_v31 }
  0x3e   :  { %v266_v25 = vpack.c.bf16 %v95_v22, %v94_v21  ;;  %v270_v32 = vpack.c.bf16 %v97_v29, %v96_v28  ;;  %v83_v40 = vmax.f32 %v448_v5, %v66_v37  ;;  %v84_v41 = vmax.f32 %v448_v5, %v67_v38 }
  0x3f   :  { %259 = vmatprep.subr.bf16.mxu0 %v258_v17  ;;  %v98_v35 = vmin.f32 %v450_v6, %v81_v33  ;;  %v99_v36 = vmin.f32 %v450_v6, %v82_v34  ;;  %v85_v47 = vmax.f32 %v448_v5, %v68_v44  ;;  %v86_v48 = vmax.f32 %v448_v5, %v69_v45 }
  0x40   :  { %261 = vmatpush3.bf16.xpose.msra.mxu0 %v258_v17  ;;  %v100_v42 = vmin.f32 %v450_v6, %v83_v40  ;;  %v101_v43 = vmin.f32 %v450_v6, %v84_v41  ;;  %v87_v54 = vmax.f32 %v448_v5, %v70_v51  ;;  %v88_v55 = vmax.f32 %v448_v5, %v71_v52 }
  0x41   :  { %263 = vmatprep.subr.bf16.mxu0 %v262_v18  ;;  %v274_v39 = vpack.c.bf16 %v99_v36, %v98_v35  ;;  %v102_v49 = vmin.f32 %v450_v6, %v85_v47  ;;  %v103_v50 = vmin.f32 %v450_v6, %v86_v48 }
  0x42   :  { %v278_v46 = vpack.c.bf16 %v101_v43, %v100_v42  ;;  %v104_v56 = vmin.f32 %v450_v6, %v87_v54  ;;  %v105_v57 = vmin.f32 %v450_v6, %v88_v55 }
  0x43   :  { %v282_v53 = vpack.c.bf16 %v103_v50, %v102_v49 }
  0x44   :  { %v286_v58 = vpack.c.bf16 %v105_v57, %v104_v56 }
  0x48   :  { %265 = vmatpush3.bf16.xpose.msra.mxu0 %v262_v18 }
  0x49   :  { %267 = vmatprep.subr.bf16.mxu0 %v266_v25 }
  0x50   :  { %269 = vmatpush3.bf16.xpose.msra.mxu0 %v266_v25 }
  0x51   :  { %271 = vmatprep.subr.bf16.mxu0 %v270_v32 }
  0x58   :  { %273 = vmatpush3.bf16.xpose.msra.mxu0 %v270_v32 }
  0x59   :  { %275 = vmatprep.subr.bf16.mxu0 %v274_v39 }
  0x60   :  { %277 = vmatpush3.bf16.xpose.msra.mxu0 %v274_v39 }
  0x61   :  { %279 = vmatprep.subr.bf16.mxu0 %v278_v46 }
  0x68   :  { %281 = vmatpush3.bf16.xpose.msra.mxu0 %v278_v46 }
  0x69   :  { %283 = vmatprep.subr.bf16.mxu0 %v282_v53 }
  0x70   :  { %285 = vmatpush3.bf16.xpose.msra.mxu0 %v282_v53 }
  0x71   :  { %287 = vmatprep.subr.bf16.mxu0 %v286_v58 }
  0x78   :  { %289 = vmatpush3.bf16.xpose.msra.mxu0 %v286_v58 }
  0x7f   :  { %256 = vmatmul.mubr.f32.vlgmr.msra.gmra.mrb[0].mxu0 %v107_v59 }
 0x152   :  { %v257_v60 = vpop.f32.mrb[0].mxu0 }
 0x153   :  { %184 = vst [vmem:[#allocation9 + $0x8] sm:$0xff] %v257_v60  ;;  %v174_v61 = vpop.f32.mrb[1].mxu0 }
 0x154   :  { %183 = vst [vmem:[#allocation9] sm:$0xff] %v174_v61 }
 0x155   :  { %361 = shalt.err (!%p358_p9)
}
 0x156   :  { %s362_s25 = scalar_lea.hbm %s502_s3, 256 }
 0x157   :  { %p363_p10 = scmp.ne.s32.totalorder %s502_s3, %s362_s25  ;;  %p366_p11 = scmp.lt.u32.totalorder %s362_s25, %s502_s3 }
 0x159   :  { %p368_p12 = pnand %p366_p11, %p363_p10 }
 0x15b   :  { %371 = shalt.err (!%p368_p12)
}
 0x15c   :  { %196 = dma.vmem_to_hbm [thread:$0]  %s191_s21, 256, %s502_s3, [#allocation4], %s382_s0, %s382_s0, %s383_s5  }
 0x15d   :  { %378 = dma.done.wait [#allocation4], 256  }
 0x15e   :  { %379 = vsyncadd [#allocation4], 4294967040 }
 0x15f   :  { %200 = vsyncpa [#allocation3], 1 }
 0x160   :  { %201 = vsyncpa [#allocation8], 1 }
 0x161   :  { %202 = vsyncpa [#allocation4], 1 }
 0x162   :  { %203 = vsyncpa [#allocation5], 1 }

</bundles_post_ra>
